<compile_context>
chip_gen: v6e
topology: v6e:2x2x1
jax: 0.10.0
libtpu: 0.0.40
codegen_flags: <defaults>
</compile_context>

<pallas_src>
import functools
import math

import jax
import jax.numpy as jnp
from jax import lax
from jax.experimental import pallas as pl
from jax.experimental.pallas import tpu as pltpu

_LANE = 128
_SUBLANE = 8
_VMEM_TILE_BUDGET = 24 * 1024 * 1024   # double-buffered in+out tiles
_VMEM_LIMIT_BYTES = 32 * 1024 * 1024   # explicit scoped-VMEM limit (all gens)
_W_MAX_BYTES = 4 * 1024 * 1024         # cap on the expanded block-diag weight
_TINY_OUT_BYTES = 256 * 1024           # below this, plain jnp beats a launch


def _cdiv(a, b):
    return -(-a // b)


def _round_up(a, m):
    return _cdiv(a, m) * m


def _num_tensorcores():
    """2 TensorCores per chip on v7x, 1 on v5e/v6e (safe default: 1)."""
    try:
        kind = jax.devices()[0].device_kind.lower()
    except Exception:
        return 1
    return 2 if ("v7" in kind or "7x" in kind) else 1


def _embed_kernel(x_ref, w_ref, b_ref, o_ref, *, chunk):
    """o[r, :] = x[r, :] @ w + b for every row r of the current block."""
    rows, ncols = x_ref.shape
    n_full = rows // chunk
    rem = rows - n_full * chunk
    use_mxu = ncols >= _SUBLANE          # aligned contraction -> MXU

    def compute(r0, nrows):
        x = x_ref[pl.ds(r0, nrows), :]                    # (nrows, C)
        b = b_ref[...]                                    # (1, P)
        if ncols == 1:
            acc = x * w_ref[...] + b                      # (nrows, P)
        elif use_mxu:
            acc = jnp.dot(x, w_ref[...],
                          preferred_element_type=jnp.float32) + b
        else:
            # C in {2, 4}: 2-4 column broadcast-MAC is ~at the write roofline.
            w = w_ref[...]
            acc = x[:, 0:1] * w[0:1, :] + b
            for c in range(1, ncols):
                acc = acc + x[:, c:c + 1] * w[c:c + 1, :]
        o_ref[pl.ds(r0, nrows), :] = acc.astype(o_ref.dtype)

    if n_full > 0:
        def body(i, carry):
            compute(pl.multiple_of(i * chunk, chunk), chunk)
            return carry
        lax.fori_loop(0, n_full, body, 0,
                      unroll=True if n_full <= 8 else 4)
    if rem > 0:
        compute(n_full * chunk, rem)


def _pack_params(w_list, bias, k):
    """Block-diagonal weight expansion + tiled bias for k-row lane packing."""
    w_stack = jnp.concatenate(w_list, axis=0)             # (feat, E)
    if k == 1:
        return w_stack, bias
    eye = jnp.eye(k, dtype=w_stack.dtype)                 # (k, k)
    w_exp = jnp.einsum("mn,ce->mcne", eye, w_stack)       # (k, feat, k, E)
    w_exp = w_exp.reshape(k * w_stack.shape[0], k * w_stack.shape[1])
    b_dense = jnp.tile(bias, (1, k))                      # (1, k*E)
    return w_exp, b_dense


def _jnp_embed(x2d, w_list, bias):
    """Plain-XLA path for tiny inputs / packing-remainder tail rows."""
    acc = x2d[:, 0:1] * w_list[0] + bias
    for c in range(1, len(w_list)):
        acc = acc + x2d[:, c:c + 1] * w_list[c]
    return acc


def _embed_pallas(x2, w_exp, b_dense, out_dtype):
    n_g, C = x2.shape
    P = w_exp.shape[-1]

    x_isz = jnp.dtype(x2.dtype).itemsize
    o_isz = jnp.dtype(out_dtype).itemsize
    w_isz = jnp.dtype(w_exp.dtype).itemsize

    # ---- tile sizing (VMEM-budgeted; conservative double-count of weights) --
    fixed = 2 * (C * P + P) * w_isz
    budget = max(4 * 1024 * 1024, _VMEM_TILE_BUDGET - fixed)
    per_row = 2 * P * o_isz + 2 * max(C, _LANE) * x_isz   # 2x-buffered, lane-padded x
    tg_cap = max(_SUBLANE, min(32768, (budget // per_row) // _SUBLANE * _SUBLANE))

    num_tc = _num_tensorcores()
    if n_g <= tg_cap:
        if num_tc > 1 and n_g >= 1024:
            # v7x: split into 2 roughly-equal "parallel" steps for the 2 TCs.
            tg = min(tg_cap, _round_up(_cdiv(n_g, 2), _SUBLANE))
        else:
            tg = n_g                                      # single full block (1 TC)
    else:
        steps = _cdiv(n_g, tg_cap)
        if num_tc > 1 and steps % 2 == 1:
            steps += 1                                    # balanced across 2 TCs
        tg = min(tg_cap, _round_up(_cdiv(n_g, steps), _SUBLANE))
    grid = (_cdiv(n_g, tg),)

    # Inner chunk: popped (chunk, P) result tile stays within ~32 vregs.
    chunk = max(_SUBLANE, min(256, ((32 * 1024) // P) // _SUBLANE * _SUBLANE))

    return pl.pallas_call(
        functools.partial(_embed_kernel, chunk=chunk),
        out_shape=jax.ShapeDtypeStruct((n_g, P), out_dtype),
        grid=grid,
        in_specs=[
            pl.BlockSpec((tg, C), lambda i: (i, 0)),      # packed x rows
            pl.BlockSpec((C, P), lambda i: (0, 0)),       # block-diag weights
            pl.BlockSpec((1, P), lambda i: (0, 0)),       # fused bias
        ],
        out_specs=pl.BlockSpec((tg, P), lambda i: (i, 0)),
        compiler_params=pltpu.CompilerParams(
            dimension_semantics=("parallel",),
            vmem_limit_bytes=_VMEM_LIMIT_BYTES),
    )(x2, w_exp, b_dense)


def embedding_forward(x, params):
    """Pallas equivalent of Embedding.forward; x is (..., 2) or (..., 1)."""
    w_in, b_in, w_t, b_t = params                         # each (1, E)
    E = w_t.shape[-1]
    feat = x.shape[-1]
    if feat not in (1, 2):
        raise ValueError("Embedding expects last dim of 1 or 2")
    lead = x.shape[:-1]
    n = math.prod(lead)
    out_dtype = jnp.result_type(x.dtype, w_t.dtype)

    if feat == 2:
        w_list, bias = [w_in, w_t], b_in + b_t
    else:                                                 # time_linear only
        w_list, bias = [w_t], b_t

    # Tiny-input shortcut: launch cost dwarfs the work; let XLA fuse it.
    out_bytes = n * E * jnp.dtype(out_dtype).itemsize
    if out_bytes <= _TINY_OUT_BYTES:
        x2d = x.reshape(n, feat)
        return _jnp_embed(x2d, w_list, bias).astype(out_dtype).reshape(*lead, E)

    # Lane-dense packing factor: k consecutive rows -> one k*E-wide output row.
    if E % _LANE == 0:
        k = 1
    else:
        k = _LANE // math.gcd(E, _LANE)
        w_isz = jnp.dtype(w_t.dtype).itemsize
        if k * feat > _LANE or (k * feat) * (k * E) * w_isz > _W_MAX_BYTES:
            k = 1                                         # fallback: plain (N, E)

    x2d = x.reshape(n, feat)
    n_main = (n // k) * k
    if n_main == 0:
        return _jnp_embed(x2d, w_list, bias).astype(out_dtype).reshape(*lead, E)

    w_exp, b_dense = _pack_params(w_list, bias, k)        # (C, P), (1, P)
    x_main = x2d[:n_main].reshape(n_main // k, k * feat)  # row-major packing
    main = _embed_pallas(x_main, w_exp, b_dense, out_dtype).reshape(n_main, E)

    if n_main == n:
        out = main
    else:
        # <= k-1 remainder rows: compute with plain jnp, append.
        tail = _jnp_embed(x2d[n_main:], w_list, bias).astype(out_dtype)
        out = jnp.concatenate([main, tail], axis=0)
    return out.reshape(*lead, E)


def init_params(key, d_embed, dtype=jnp.float32):
    # nn.Linear(1, d_embed): fan_in = 1 -> uniform(-1, 1) init, kept as (1, E).
    k1, k2, k3, k4 = jax.random.split(key, 4)
    w_in = jax.random.uniform(k1, (1, d_embed), dtype, -1.0, 1.0)
    b_in = jax.random.uniform(k2, (1, d_embed), dtype, -1.0, 1.0)
    w_t = jax.random.uniform(k3, (1, d_embed), dtype, -1.0, 1.0)
    b_t = jax.random.uniform(k4, (1, d_embed), dtype, -1.0, 1.0)
    return w_in, b_in, w_t, b_t


def embedding_ref(x, params):
    w_in, b_in, w_t, b_t = params
    if x.shape[-1] == 2:
        return (x[..., 0:1] * w_in + b_in) + (x[..., 1:2] * w_t + b_t)
    return x * w_t + b_t


if __name__ == "__main__":
    key = jax.random.PRNGKey(0)
    kx, kp, kp40, kp33 = jax.random.split(key, 4)

    # spec-sized small case (batch=2, seq=8, d_embed=32): tiny-input jnp path
    params = init_params(kp, 32)
    x = jax.random.normal(kx, (2, 8, 2), jnp.float32)
    out = jax.block_until_ready(embedding_forward(x, params))
    assert out.shape == (2, 8, 32), out.shape
    assert jnp.allclose(out, embedding_ref(x, params), atol=1e-4, rtol=1e-4)

    # else-branch: last dim == 1 (time_linear only)
    x1 = jax.random.normal(kx, (2, 8, 1), jnp.float32)
    out1 = jax.block_until_ready(embedding_forward(x1, params))
    assert jnp.allclose(out1, embedding_ref(x1, params), atol=1e-4, rtol=1e-4)

    # kernel path: packed k=4, C=8 -> MXU dot, lane-dense output
    xk = jax.random.normal(kx, (4, 1024, 2), jnp.float32)
    outk = jax.block_until_ready(embedding_forward(xk, params))
    assert jnp.allclose(outk, embedding_ref(xk, params), atol=1e-4, rtol=1e-4)

    # kernel path with row count not a multiple of chunk (rem path in kernel)
    xm = jax.random.normal(kx, (2, 2050, 2), jnp.float32)
    outm = jax.block_until_ready(embedding_forward(xm, params))
    assert jnp.allclose(outm, embedding_ref(xm, params), atol=1e-4, rtol=1e-4)

    # E=40 (k=16, C=32 -> MXU) with n % k != 0: packed prefix + jnp tail rows
    params40 = init_params(kp40, 40)
    x40 = jax.random.normal(kx, (1, 4098, 2), jnp.float32)
    out40 = jax.block_until_ready(embedding_forward(x40, params40))
    assert out40.shape == (1, 4098, 40), out40.shape
    assert jnp.allclose(out40, embedding_ref(x40, params40), atol=1e-4, rtol=1e-4)

    # feat=1 kernel path: E=32 -> k=4, C=4 -> small-C VPU branch
    xk1 = jax.random.normal(kx, (4, 1024, 1), jnp.float32)
    outk1 = jax.block_until_ready(embedding_forward(xk1, params))
    assert jnp.allclose(outk1, embedding_ref(xk1, params), atol=1e-4, rtol=1e-4)

    # odd E=33 -> packing not applicable (k=1 fallback, masked-width output)
    params33 = init_params(kp33, 33)
    x33 = jax.random.normal(kx, (1, 8200, 2), jnp.float32)
    out33 = jax.block_until_ready(embedding_forward(x33, params33))
    assert jnp.allclose(out33, embedding_ref(x33, params33), atol=1e-4, rtol=1e-4)

    print("KERNEL_OK")
</pallas_src>

<mosaic_0001>
module attributes {stable_mosaic.version = 11 : i64} {
  func.func @_embed_kernel(%arg0: i32, %arg1: memref<1024x8xf32, #tpu.memory_space<vmem>>, %arg2: memref<8x128xf32, #tpu.memory_space<vmem>>, %arg3: memref<1x128xf32, #tpu.memory_space<vmem>>, %arg4: memref<1024x128xf32, #tpu.memory_space<vmem>>) attributes {dimension_semantics = [#tpu.dimension_semantics<parallel>], iteration_bounds = array<i64: 1>, scalar_prefetch = 0 : i64, scratch_operands = 0 : i64, tpu.core_type = #tpu.core_type<tc>, window_params = [{transform_indices = @transform_0, window_bounds = array<i64: 1024, 8>}, {pipeline_mode = #tpu.pipeline_mode<synchronous>, transform_indices = @transform_1, window_bounds = array<i64: 8, 128>}, {pipeline_mode = #tpu.pipeline_mode<synchronous>, transform_indices = @transform_2, window_bounds = array<i64: 1, 128>}, {transform_indices = @transform_3, window_bounds = array<i64: 1024, 128>}]} {
    %c0_i32 = arith.constant 0 : i32
    %c256_i32 = arith.constant 256 : i32
    %0 = arith.muli %c0_i32, %c256_i32 : i32
    %1 = tpu.assume_multiple %0, 256 : i32
    %2 = arith.index_cast %1 : i32 to index
    %c0 = arith.constant 0 : index
    %3 = vector.load %arg1[%2, %c0] : memref<1024x8xf32, #tpu.memory_space<vmem>>, vector<256x8xf32>
    %c0_0 = arith.constant 0 : index
    %c0_1 = arith.constant 0 : index
    %4 = vector.load %arg3[%c0_0, %c0_1] : memref<1x128xf32, #tpu.memory_space<vmem>>, vector<1x128xf32>
    %c0_2 = arith.constant 0 : index
    %c0_3 = arith.constant 0 : index
    %5 = vector.load %arg2[%c0_2, %c0_3] : memref<8x128xf32, #tpu.memory_space<vmem>>, vector<8x128xf32>
    %cst = arith.constant dense<0.000000e+00> : vector<256x128xf32>
    %6 = tpu.matmul %3, %5, %cst {dimension_numbers = #tpu.dot_dimension_numbers<[1], [0], [0], [1], [0, 0, 1, 1], [], []>} : vector<256x8xf32>, vector<8x128xf32>, vector<256x128xf32> -> vector<256x128xf32>
    %7 = vector.broadcast %4 : vector<1x128xf32> to vector<256x128xf32>
    %8 = arith.addf %6, %7 : vector<256x128xf32>
    %9 = arith.index_cast %1 : i32 to index
    %c0_4 = arith.constant 0 : index
    %10 = vector.load %arg4[%9, %c0_4] : memref<1024x128xf32, #tpu.memory_space<vmem>>, vector<256x128xf32>
    tpu.vector_store %arg4[%9, %c0_4], %8 {strides = array<i32>} : memref<1024x128xf32, #tpu.memory_space<vmem>>, vector<256x128xf32>,
    %c1_i32 = arith.constant 1 : i32
    %c256_i32_5 = arith.constant 256 : i32
    %11 = arith.muli %c1_i32, %c256_i32_5 : i32
    %12 = tpu.assume_multiple %11, 256 : i32
    %13 = arith.index_cast %12 : i32 to index
    %c0_6 = arith.constant 0 : index
    %14 = vector.load %arg1[%13, %c0_6] : memref<1024x8xf32, #tpu.memory_space<vmem>>, vector<256x8xf32>
    %c0_7 = arith.constant 0 : index
    %c0_8 = arith.constant 0 : index
    %15 = vector.load %arg3[%c0_7, %c0_8] : memref<1x128xf32, #tpu.memory_space<vmem>>, vector<1x128xf32>
    %c0_9 = arith.constant 0 : index
    %c0_10 = arith.constant 0 : index
    %16 = vector.load %arg2[%c0_9, %c0_10] : memref<8x128xf32, #tpu.memory_space<vmem>>, vector<8x128xf32>
    %cst_11 = arith.constant dense<0.000000e+00> : vector<256x128xf32>
    %17 = tpu.matmul %14, %16, %cst_11 {dimension_numbers = #tpu.dot_dimension_numbers<[1], [0], [0], [1], [0, 0, 1, 1], [], []>} : vector<256x8xf32>, vector<8x128xf32>, vector<256x128xf32> -> vector<256x128xf32>
    %18 = vector.broadcast %15 : vector<1x128xf32> to vector<256x128xf32>
    %19 = arith.addf %17, %18 : vector<256x128xf32>
    %20 = arith.index_cast %12 : i32 to index
    %c0_12 = arith.constant 0 : index
    %21 = vector.load %arg4[%20, %c0_12] : memref<1024x128xf32, #tpu.memory_space<vmem>>, vector<256x128xf32>
    tpu.vector_store %arg4[%20, %c0_12], %19 {strides = array<i32>} : memref<1024x128xf32, #tpu.memory_space<vmem>>, vector<256x128xf32>,
    %c2_i32 = arith.constant 2 : i32
    %c256_i32_13 = arith.constant 256 : i32
    %22 = arith.muli %c2_i32, %c256_i32_13 : i32
    %23 = tpu.assume_multiple %22, 256 : i32
    %24 = arith.index_cast %23 : i32 to index
    %c0_14 = arith.constant 0 : index
    %25 = vector.load %arg1[%24, %c0_14] : memref<1024x8xf32, #tpu.memory_space<vmem>>, vector<256x8xf32>
    %c0_15 = arith.constant 0 : index
    %c0_16 = arith.constant 0 : index
    %26 = vector.load %arg3[%c0_15, %c0_16] : memref<1x128xf32, #tpu.memory_space<vmem>>, vector<1x128xf32>
    %c0_17 = arith.constant 0 : index
    %c0_18 = arith.constant 0 : index
    %27 = vector.load %arg2[%c0_17, %c0_18] : memref<8x128xf32, #tpu.memory_space<vmem>>, vector<8x128xf32>
    %cst_19 = arith.constant dense<0.000000e+00> : vector<256x128xf32>
    %28 = tpu.matmul %25, %27, %cst_19 {dimension_numbers = #tpu.dot_dimension_numbers<[1], [0], [0], [1], [0, 0, 1, 1], [], []>} : vector<256x8xf32>, vector<8x128xf32>, vector<256x128xf32> -> vector<256x128xf32>
    %29 = vector.broadcast %26 : vector<1x128xf32> to vector<256x128xf32>
    %30 = arith.addf %28, %29 : vector<256x128xf32>
    %31 = arith.index_cast %23 : i32 to index
    %c0_20 = arith.constant 0 : index
    %32 = vector.load %arg4[%31, %c0_20] : memref<1024x128xf32, #tpu.memory_space<vmem>>, vector<256x128xf32>
    tpu.vector_store %arg4[%31, %c0_20], %30 {strides = array<i32>} : memref<1024x128xf32, #tpu.memory_space<vmem>>, vector<256x128xf32>,
    %c3_i32 = arith.constant 3 : i32
    %c256_i32_21 = arith.constant 256 : i32
    %33 = arith.muli %c3_i32, %c256_i32_21 : i32
    %34 = tpu.assume_multiple %33, 256 : i32
    %35 = arith.index_cast %34 : i32 to index
    %c0_22 = arith.constant 0 : index
    %36 = vector.load %arg1[%35, %c0_22] : memref<1024x8xf32, #tpu.memory_space<vmem>>, vector<256x8xf32>
    %c0_23 = arith.constant 0 : index
    %c0_24 = arith.constant 0 : index
    %37 = vector.load %arg3[%c0_23, %c0_24] : memref<1x128xf32, #tpu.memory_space<vmem>>, vector<1x128xf32>
    %c0_25 = arith.constant 0 : index
    %c0_26 = arith.constant 0 : index
    %38 = vector.load %arg2[%c0_25, %c0_26] : memref<8x128xf32, #tpu.memory_space<vmem>>, vector<8x128xf32>
    %cst_27 = arith.constant dense<0.000000e+00> : vector<256x128xf32>
    %39 = tpu.matmul %36, %38, %cst_27 {dimension_numbers = #tpu.dot_dimension_numbers<[1], [0], [0], [1], [0, 0, 1, 1], [], []>} : vector<256x8xf32>, vector<8x128xf32>, vector<256x128xf32> -> vector<256x128xf32>
    %40 = vector.broadcast %37 : vector<1x128xf32> to vector<256x128xf32>
    %41 = arith.addf %39, %40 : vector<256x128xf32>
    %42 = arith.index_cast %34 : i32 to index
    %c0_28 = arith.constant 0 : index
    %43 = vector.load %arg4[%42, %c0_28] : memref<1024x128xf32, #tpu.memory_space<vmem>>, vector<256x128xf32>
    tpu.vector_store %arg4[%42, %c0_28], %41 {strides = array<i32>} : memref<1024x128xf32, #tpu.memory_space<vmem>>, vector<256x128xf32>,
    %c4_i32 = arith.constant 4 : i32
    return
  }
  func.func @transform_0(%arg0: i32) -> (i32, i32) {
    %c0_i32 = arith.constant 0 : i32
    %c0_i32_0 = arith.constant 0 : i32
    return %arg0, %c0_i32 : i32, i32
  }
  func.func @transform_1(%arg0: i32) -> (i32, i32) {
    %c0_i32 = arith.constant 0 : i32
    %c0_i32_0 = arith.constant 0 : i32
    %c0_i32_1 = arith.constant 0 : i32
    return %c0_i32, %c0_i32_0 : i32, i32
  }
  func.func @transform_2(%arg0: i32) -> (i32, i32) {
    %c0_i32 = arith.constant 0 : i32
    %c0_i32_0 = arith.constant 0 : i32
    %c0_i32_1 = arith.constant 0 : i32
    return %c0_i32, %c0_i32_0 : i32, i32
  }
  func.func @transform_3(%arg0: i32) -> (i32, i32) {
    %c0_i32 = arith.constant 0 : i32
    %c0_i32_0 = arith.constant 0 : i32
    return %arg0, %c0_i32 : i32, i32
  }
}

</mosaic_0001>

<bundles_post_ra>
// kernel: tpu_custom_call.1
= control target key start
LH: loop header
LB: loop body
LE: loop exit
PB: predicated region body
PF: predicated region fallthrough
CT: control target
= control target key end

     0   :  { %vm55_vm0 = vcmask 64512   ;;  %s2869_s0 = inlined_call_operand.vmem [shape: f32[1024,8], index: 0, kind: input, shape index: {}]   ;;  %s2870_s1 = inlined_call_operand.vmem [shape: f32[8,128], index: 1, kind: input, shape index: {}]   ;;  %s2871_s2 = inlined_call_operand.vmem [shape: f32[1,128], index: 2, kind: input, shape index: {}]   ;;  %s2872_s3 = inlined_call_operand.hbm [shape: f32[1024,128], index: 3, kind: output, shape index: {}]  }
   0x1   :  { %v48_v0 = vld [vmem:[%s2870_s1] sm:$0xff]  ;;  %v16_v3 = vld [vmem:[%s2869_s0 + $0x8] sm:$0xff]  ;;  %v17_v5 = vld [vmem:[%s2869_s0 + $0x10] sm:$0xff] }
   0x2   :  { %v15_v1 = vld [vmem:[%s2869_s0] sm:$0xff]  ;;  %1970 = vmatprep.subr.mxu0 %v48_v0  ;;  %2020 = vmatprep.subr.mxu1 %v48_v0  ;;  %v1644_v4 = vld [vmem:[%s2869_s0 + $0x108] sm:$0xff]  ;;  %v1645_v6 = vld [vmem:[%s2869_s0 + $0x110] sm:$0xff] }
   0x3   :  { %v1643_v2 = vld [vmem:[%s2869_s0 + $0x100] sm:$0xff]  ;;  %1971 = vmatpush3.msra.mxu0 %v48_v0  ;;  %1972 = vmatprep.mubr.msk.f32.mxu0 %vm55_vm0, %v15_v1  ;;  %v18_v7 = vld [vmem:[%s2869_s0 + $0x18] sm:$0xff]  ;;  %v20_v11 = vld [vmem:[%s2869_s0 + $0x28] sm:$0xff] }
   0x4   :  { %2021 = vmatpush3.msra.mxu1 %v48_v0  ;;  %2022 = vmatprep.mubr.msk.f32.mxu1 %vm55_vm0, %v1643_v2  ;;  %v1646_v8 = vld [vmem:[%s2869_s0 + $0x118] sm:$0xff]  ;;  %v19_v9 = vld [vmem:[%s2869_s0 + $0x20] sm:$0xff]  ;;  %v1648_v12 = vld [vmem:[%s2869_s0 + $0x128] sm:$0xff] }
   0x5   :  { %1973 = vmatmul.mubr.msk.f32.vlgmr.msra.gmra.mxu0 %vm55_vm0, %v16_v3  ;;  %2023 = vmatmul.mubr.msk.f32.vlgmr.msra.gmra.mxu1 %vm55_vm0, %v1644_v4  ;;  %v1647_v10 = vld [vmem:[%s2869_s0 + $0x120] sm:$0xff]  ;;  %v21_v13 = vld [vmem:[%s2869_s0 + $0x30] sm:$0xff]  ;;  %v22_v15 = vld [vmem:[%s2869_s0 + $0x38] sm:$0xff] }
   0x6   :  { %2070 = vmatprep.subr.mxu0 %v48_v0  ;;  %2120 = vmatprep.subr.mxu1 %v48_v0  ;;  %v1649_v14 = vld [vmem:[%s2869_s0 + $0x130] sm:$0xff]  ;;  %v1650_v16 = vld [vmem:[%s2869_s0 + $0x138] sm:$0xff]  ;;  %v23_v17 = vld [vmem:[%s2869_s0 + $0x40] sm:$0xff] }
   0x7   :  { %2071 = vmatpush3.msra.mxu0 %v48_v0  ;;  %2121 = vmatpush3.msra.mxu1 %v48_v0  ;;  %v1651_v18 = vld [vmem:[%s2869_s0 + $0x140] sm:$0xff]  ;;  %v24_v19 = vld [vmem:[%s2869_s0 + $0x48] sm:$0xff]  ;;  %v25_v21 = vld [vmem:[%s2869_s0 + $0x50] sm:$0xff] }
   0x8   :  { %1975 = vmatprep.mubr.msk.f32.mxu0 %vm55_vm0, %v17_v5  ;;  %2025 = vmatprep.mubr.msk.f32.mxu1 %vm55_vm0, %v1645_v6  ;;  %v1652_v20 = vld [vmem:[%s2869_s0 + $0x148] sm:$0xff]  ;;  %v1653_v22 = vld [vmem:[%s2869_s0 + $0x150] sm:$0xff]  ;;  %v26_v23 = vld [vmem:[%s2869_s0 + $0x58] sm:$0xff] }
   0x9   :  { %1976 = vmatmul.mubr.msk.f32.gmra.mxu0 %vm55_vm0, %v18_v7  ;;  %2026 = vmatmul.mubr.msk.f32.gmra.mxu1 %vm55_vm0, %v1646_v8  ;;  %v1654_v24 = vld [vmem:[%s2869_s0 + $0x158] sm:$0xff]  ;;  %v27_v25 = vld [vmem:[%s2869_s0 + $0x60] sm:$0xff]  ;;  %v28_v27 = vld [vmem:[%s2869_s0 + $0x68] sm:$0xff] }
   0xa   :  { %1978 = vmatprep.mubr.msk.f32.mxu0 %vm55_vm0, %v19_v9  ;;  %2028 = vmatprep.mubr.msk.f32.mxu1 %vm55_vm0, %v1647_v10  ;;  %v1655_v26 = vld [vmem:[%s2869_s0 + $0x160] sm:$0xff]  ;;  %v1656_v28 = vld [vmem:[%s2869_s0 + $0x168] sm:$0xff]  ;;  %v29_v29 = vld [vmem:[%s2869_s0 + $0x70] sm:$0xff] }
   0xb   :  { %v1657_v30 = vld [vmem:[%s2869_s0 + $0x170] sm:$0xff]  ;;  %v30_v31 = vld [vmem:[%s2869_s0 + $0x78] sm:$0xff]  ;;  %v31_v33 = vld [vmem:[%s2869_s0 + $0x80] sm:$0xff] }
   0xc   :  { %v1658_v32 = vld [vmem:[%s2869_s0 + $0x178] sm:$0xff]  ;;  %v1659_v34 = vld [vmem:[%s2869_s0 + $0x180] sm:$0xff]  ;;  %v32_v35 = vld [vmem:[%s2869_s0 + $0x88] sm:$0xff] }
   0xd   :  { %1979 = vmatmul.mubr.msk.f32.gmra.mxu0 %vm55_vm0, %v20_v11  ;;  %2029 = vmatmul.mubr.msk.f32.gmra.mxu1 %vm55_vm0, %v1648_v12  ;;  %v1660_v36 = vld [vmem:[%s2869_s0 + $0x188] sm:$0xff]  ;;  %v33_v37 = vld [vmem:[%s2869_s0 + $0x90] sm:$0xff]  ;;  %v34_v39 = vld [vmem:[%s2869_s0 + $0x98] sm:$0xff] }
   0xe   :  { %1981 = vmatprep.mubr.msk.f32.mxu0 %vm55_vm0, %v21_v13  ;;  %2031 = vmatprep.mubr.msk.f32.mxu1 %vm55_vm0, %v1649_v14  ;;  %v1661_v38 = vld [vmem:[%s2869_s0 + $0x190] sm:$0xff]  ;;  %v1662_v40 = vld [vmem:[%s2869_s0 + $0x198] sm:$0xff]  ;;  %v35_v41 = vld [vmem:[%s2869_s0 + $0xa0] sm:$0xff] }
   0xf   :  { %v1663_v42 = vld [vmem:[%s2869_s0 + $0x1a0] sm:$0xff]  ;;  %v36_v43 = vld [vmem:[%s2869_s0 + $0xa8] sm:$0xff]  ;;  %v37_v45 = vld [vmem:[%s2869_s0 + $0xb0] sm:$0xff] }
  0x10   :  { %v1664_v44 = vld [vmem:[%s2869_s0 + $0x1a8] sm:$0xff]  ;;  %v1665_v46 = vld [vmem:[%s2869_s0 + $0x1b0] sm:$0xff] }
  0x11   :  { %1982 = vmatmul.mubr.msk.f32.gmra.mxu0 %vm55_vm0, %v22_v15  ;;  %2032 = vmatmul.mubr.msk.f32.gmra.mxu1 %vm55_vm0, %v1650_v16 }
  0x12   :  { %1984 = vmatprep.mubr.msk.f32.mxu0 %vm55_vm0, %v23_v17  ;;  %2034 = vmatprep.mubr.msk.f32.mxu1 %vm55_vm0, %v1651_v18 }
  0x15   :  { %1985 = vmatmul.mubr.msk.f32.gmra.mxu0 %vm55_vm0, %v24_v19  ;;  %2035 = vmatmul.mubr.msk.f32.gmra.mxu1 %vm55_vm0, %v1652_v20 }
  0x16   :  { %1987 = vmatprep.mubr.msk.f32.mxu0 %vm55_vm0, %v25_v21  ;;  %2037 = vmatprep.mubr.msk.f32.mxu1 %vm55_vm0, %v1653_v22 }
  0x19   :  { %1988 = vmatmul.mubr.msk.f32.gmra.mxu0 %vm55_vm0, %v26_v23  ;;  %2038 = vmatmul.mubr.msk.f32.gmra.mxu1 %vm55_vm0, %v1654_v24 }
  0x1a   :  { %1990 = vmatprep.mubr.msk.f32.mxu0 %vm55_vm0, %v27_v25  ;;  %2040 = vmatprep.mubr.msk.f32.mxu1 %vm55_vm0, %v1655_v26 }
  0x1d   :  { %1991 = vmatmul.mubr.msk.f32.gmra.mxu0 %vm55_vm0, %v28_v27  ;;  %2041 = vmatmul.mubr.msk.f32.gmra.mxu1 %vm55_vm0, %v1656_v28 }
  0x1e   :  { %1993 = vmatprep.mubr.msk.f32.mxu0 %vm55_vm0, %v29_v29  ;;  %2043 = vmatprep.mubr.msk.f32.mxu1 %vm55_vm0, %v1657_v30 }
  0x21   :  { %1994 = vmatmul.mubr.msk.f32.gmra.mxu0 %vm55_vm0, %v30_v31  ;;  %2044 = vmatmul.mubr.msk.f32.gmra.mxu1 %vm55_vm0, %v1658_v32 }
  0x22   :  { %1996 = vmatprep.mubr.msk.f32.mxu0 %vm55_vm0, %v31_v33  ;;  %2046 = vmatprep.mubr.msk.f32.mxu1 %vm55_vm0, %v1659_v34 }
  0x25   :  { %1997 = vmatmul.mubr.msk.f32.gmra.mxu0 %vm55_vm0, %v32_v35  ;;  %2047 = vmatmul.mubr.msk.f32.gmra.mxu1 %vm55_vm0, %v1660_v36 }
  0x26   :  { %1999 = vmatprep.mubr.msk.f32.mxu0 %vm55_vm0, %v33_v37  ;;  %2049 = vmatprep.mubr.msk.f32.mxu1 %vm55_vm0, %v1661_v38 }
  0x29   :  { %2000 = vmatmul.mubr.msk.f32.gmra.mxu0 %vm55_vm0, %v34_v39  ;;  %2050 = vmatmul.mubr.msk.f32.gmra.mxu1 %vm55_vm0, %v1662_v40 }
  0x2a   :  { %2002 = vmatprep.mubr.msk.f32.mxu0 %vm55_vm0, %v35_v41  ;;  %2052 = vmatprep.mubr.msk.f32.mxu1 %vm55_vm0, %v1663_v42 }
  0x2b   :  { %8 = vsyncpa [#allocation3], 0  ;;  %v38_v47 = vld [vmem:[%s2869_s0 + $0xb8] sm:$0xff]  ;;  %v39_v49 = vld [vmem:[%s2869_s0 + $0xc0] sm:$0xff] }
  0x2c   :  { %v1666_v48 = vld [vmem:[%s2869_s0 + $0x1b8] sm:$0xff]  ;;  %v1667_v50 = vld [vmem:[%s2869_s0 + $0x1c0] sm:$0xff]  ;;  %v40_v51 = vld [vmem:[%s2869_s0 + $0xc8] sm:$0xff] }
  0x2d   :  { %2003 = vmatmul.mubr.msk.f32.gmra.mxu0 %vm55_vm0, %v36_v43  ;;  %2053 = vmatmul.mubr.msk.f32.gmra.mxu1 %vm55_vm0, %v1664_v44  ;;  %v1668_v52 = vld [vmem:[%s2869_s0 + $0x1c8] sm:$0xff]  ;;  %v41_v53 = vld [vmem:[%s2869_s0 + $0xd0] sm:$0xff]  ;;  %v42_v55 = vld [vmem:[%s2869_s0 + $0xd8] sm:$0xff] }
  0x2e   :  { %2005 = vmatprep.mubr.msk.f32.mxu0 %vm55_vm0, %v37_v45  ;;  %2055 = vmatprep.mubr.msk.f32.mxu1 %vm55_vm0, %v1665_v46  ;;  %v1669_v54 = vld [vmem:[%s2869_s0 + $0x1d0] sm:$0xff]  ;;  %v1670_v56 = vld [vmem:[%s2869_s0 + $0x1d8] sm:$0xff]  ;;  %v43_v57 = vld [vmem:[%s2869_s0 + $0xe0] sm:$0xff] }
  0x2f   :  { %v1671_v58 = vld [vmem:[%s2869_s0 + $0x1e0] sm:$0xff]  ;;  %v44_v59 = vld [vmem:[%s2869_s0 + $0xe8] sm:$0xff]  ;;  %v45_v61 = vld [vmem:[%s2869_s0 + $0xf0] sm:$0xff] }
  0x30   :  { %v1672_v60 = vld [vmem:[%s2869_s0 + $0x1e8] sm:$0xff]  ;;  %v1673_v62 = vld [vmem:[%s2869_s0 + $0x1f0] sm:$0xff]  ;;  %v46_v63 = vld [vmem:[%s2869_s0 + $0xf8] sm:$0xff] }
  0x31   :  { %2006 = vmatmul.mubr.msk.f32.gmra.mxu0 %vm55_vm0, %v38_v47  ;;  %2056 = vmatmul.mubr.msk.f32.gmra.mxu1 %vm55_vm0, %v1666_v48  ;;  %v1674_v0 = vld [vmem:[%s2869_s0 + $0x1f8] sm:$0xff]  ;;  %v1708_v1 = vld [vmem:[%s2869_s0 + $0x200] sm:$0xff]  ;;  %v1709_v3 = vld [vmem:[%s2869_s0 + $0x208] sm:$0xff] }
  0x32   :  { %2008 = vmatprep.mubr.msk.f32.mxu0 %vm55_vm0, %v39_v49  ;;  %2058 = vmatprep.mubr.msk.f32.mxu1 %vm55_vm0, %v1667_v50  ;;  %v1773_v2 = vld [vmem:[%s2869_s0 + $0x300] sm:$0xff]  ;;  %v1774_v4 = vld [vmem:[%s2869_s0 + $0x308] sm:$0xff]  ;;  %v1710_v5 = vld [vmem:[%s2869_s0 + $0x210] sm:$0xff] }
  0x33   :  { %v1775_v6 = vld [vmem:[%s2869_s0 + $0x310] sm:$0xff]  ;;  %v1711_v7 = vld [vmem:[%s2869_s0 + $0x218] sm:$0xff]  ;;  %v1712_v9 = vld [vmem:[%s2869_s0 + $0x220] sm:$0xff] }
  0x34   :  { %v1776_v8 = vld [vmem:[%s2869_s0 + $0x318] sm:$0xff]  ;;  %v1777_v10 = vld [vmem:[%s2869_s0 + $0x320] sm:$0xff]  ;;  %v1713_v11 = vld [vmem:[%s2869_s0 + $0x228] sm:$0xff] }
  0x35   :  { %2009 = vmatmul.mubr.msk.f32.gmra.mxu0 %vm55_vm0, %v40_v51  ;;  %2059 = vmatmul.mubr.msk.f32.gmra.mxu1 %vm55_vm0, %v1668_v52  ;;  %v1778_v12 = vld [vmem:[%s2869_s0 + $0x328] sm:$0xff]  ;;  %v1714_v13 = vld [vmem:[%s2869_s0 + $0x230] sm:$0xff]  ;;  %v1715_v15 = vld [vmem:[%s2869_s0 + $0x238] sm:$0xff] }
  0x36   :  { %2011 = vmatprep.mubr.msk.f32.mxu0 %vm55_vm0, %v41_v53  ;;  %2061 = vmatprep.mubr.msk.f32.mxu1 %vm55_vm0, %v1669_v54  ;;  %v1779_v14 = vld [vmem:[%s2869_s0 + $0x330] sm:$0xff]  ;;  %v1780_v16 = vld [vmem:[%s2869_s0 + $0x338] sm:$0xff]  ;;  %v1716_v17 = vld [vmem:[%s2869_s0 + $0x240] sm:$0xff] }
  0x37   :  { %v1781_v18 = vld [vmem:[%s2869_s0 + $0x340] sm:$0xff]  ;;  %v1717_v19 = vld [vmem:[%s2869_s0 + $0x248] sm:$0xff]  ;;  %v1718_v21 = vld [vmem:[%s2869_s0 + $0x250] sm:$0xff] }
  0x38   :  { %v1782_v20 = vld [vmem:[%s2869_s0 + $0x348] sm:$0xff]  ;;  %v1783_v22 = vld [vmem:[%s2869_s0 + $0x350] sm:$0xff]  ;;  %v1719_v23 = vld [vmem:[%s2869_s0 + $0x258] sm:$0xff] }
  0x39   :  { %2012 = vmatmul.mubr.msk.f32.gmra.mxu0 %vm55_vm0, %v42_v55  ;;  %2062 = vmatmul.mubr.msk.f32.gmra.mxu1 %vm55_vm0, %v1670_v56  ;;  %v1784_v24 = vld [vmem:[%s2869_s0 + $0x358] sm:$0xff]  ;;  %v1720_v25 = vld [vmem:[%s2869_s0 + $0x260] sm:$0xff]  ;;  %v1721_v27 = vld [vmem:[%s2869_s0 + $0x268] sm:$0xff] }
  0x3a   :  { %2014 = vmatprep.mubr.msk.f32.mxu0 %vm55_vm0, %v43_v57  ;;  %2064 = vmatprep.mubr.msk.f32.mxu1 %vm55_vm0, %v1671_v58  ;;  %v1785_v26 = vld [vmem:[%s2869_s0 + $0x360] sm:$0xff]  ;;  %v1786_v28 = vld [vmem:[%s2869_s0 + $0x368] sm:$0xff]  ;;  %v1722_v29 = vld [vmem:[%s2869_s0 + $0x270] sm:$0xff] }
  0x3b   :  { %v1787_v30 = vld [vmem:[%s2869_s0 + $0x370] sm:$0xff]  ;;  %v1723_v31 = vld [vmem:[%s2869_s0 + $0x278] sm:$0xff]  ;;  %v1724_v33 = vld [vmem:[%s2869_s0 + $0x280] sm:$0xff] }
  0x3c   :  { %v1788_v32 = vld [vmem:[%s2869_s0 + $0x378] sm:$0xff]  ;;  %v1789_v34 = vld [vmem:[%s2869_s0 + $0x380] sm:$0xff]  ;;  %v1725_v35 = vld [vmem:[%s2869_s0 + $0x288] sm:$0xff] }
  0x3d   :  { %2015 = vmatmul.mubr.msk.f32.gmra.mxu0 %vm55_vm0, %v44_v59  ;;  %2065 = vmatmul.mubr.msk.f32.gmra.mxu1 %vm55_vm0, %v1672_v60  ;;  %v1790_v36 = vld [vmem:[%s2869_s0 + $0x388] sm:$0xff]  ;;  %v1726_v37 = vld [vmem:[%s2869_s0 + $0x290] sm:$0xff]  ;;  %v1727_v39 = vld [vmem:[%s2869_s0 + $0x298] sm:$0xff] }
  0x3e   :  { %2017 = vmatprep.mubr.msk.f32.mxu0 %vm55_vm0, %v45_v61  ;;  %2067 = vmatprep.mubr.msk.f32.mxu1 %vm55_vm0, %v1673_v62  ;;  %v1791_v38 = vld [vmem:[%s2869_s0 + $0x390] sm:$0xff]  ;;  %v1792_v40 = vld [vmem:[%s2869_s0 + $0x398] sm:$0xff]  ;;  %v1728_v41 = vld [vmem:[%s2869_s0 + $0x2a0] sm:$0xff] }
  0x3f   :  { %v1793_v42 = vld [vmem:[%s2869_s0 + $0x3a0] sm:$0xff]  ;;  %v1729_v43 = vld [vmem:[%s2869_s0 + $0x2a8] sm:$0xff]  ;;  %v1730_v45 = vld [vmem:[%s2869_s0 + $0x2b0] sm:$0xff] }
  0x40   :  { %v1794_v44 = vld [vmem:[%s2869_s0 + $0x3a8] sm:$0xff]  ;;  %v1795_v46 = vld [vmem:[%s2869_s0 + $0x3b0] sm:$0xff]  ;;  %v1731_v47 = vld [vmem:[%s2869_s0 + $0x2b8] sm:$0xff] }
  0x41   :  { %2018 = vmatmul.mubr.msk.f32.gmra.mxu0 %vm55_vm0, %v46_v63  ;;  %2068 = vmatmul.mubr.msk.f32.gmra.mxu1 %vm55_vm0, %v1674_v0  ;;  %v1796_v48 = vld [vmem:[%s2869_s0 + $0x3b8] sm:$0xff]  ;;  %v1732_v49 = vld [vmem:[%s2869_s0 + $0x2c0] sm:$0xff]  ;;  %v1733_v51 = vld [vmem:[%s2869_s0 + $0x2c8] sm:$0xff] }
  0x42   :  { %2072 = vmatprep.mubr.msk.f32.mxu0 %vm55_vm0, %v1708_v1  ;;  %2122 = vmatprep.mubr.msk.f32.mxu1 %vm55_vm0, %v1773_v2  ;;  %v1797_v50 = vld [vmem:[%s2869_s0 + $0x3c0] sm:$0xff]  ;;  %v1798_v52 = vld [vmem:[%s2869_s0 + $0x3c8] sm:$0xff]  ;;  %v1734_v53 = vld [vmem:[%s2869_s0 + $0x2d0] sm:$0xff] }
  0x43   :  { %v1799_v54 = vld [vmem:[%s2869_s0 + $0x3d0] sm:$0xff]  ;;  %v1735_v55 = vld [vmem:[%s2869_s0 + $0x2d8] sm:$0xff]  ;;  %v1736_v57 = vld [vmem:[%s2869_s0 + $0x2e0] sm:$0xff] }
  0x44   :  { %v1800_v56 = vld [vmem:[%s2869_s0 + $0x3d8] sm:$0xff]  ;;  %v1801_v58 = vld [vmem:[%s2869_s0 + $0x3e0] sm:$0xff]  ;;  %v1737_v59 = vld [vmem:[%s2869_s0 + $0x2e8] sm:$0xff] }
  0x45   :  { %2073 = vmatmul.mubr.msk.f32.vlgmr.msra.gmra.mxu0 %vm55_vm0, %v1709_v3  ;;  %2123 = vmatmul.mubr.msk.f32.vlgmr.msra.gmra.mxu1 %vm55_vm0, %v1774_v4  ;;  %v1802_v60 = vld [vmem:[%s2869_s0 + $0x3e8] sm:$0xff]  ;;  %v1738_v61 = vld [vmem:[%s2869_s0 + $0x2f0] sm:$0xff]  ;;  %v1739_v63 = vld [vmem:[%s2869_s0 + $0x2f8] sm:$0xff] }
  0x46   :  { %2075 = vmatprep.mubr.msk.f32.mxu0 %vm55_vm0, %v1710_v5  ;;  %2125 = vmatprep.mubr.msk.f32.mxu1 %vm55_vm0, %v1775_v6  ;;  %v1803_v62 = vld [vmem:[%s2869_s0 + $0x3f0] sm:$0xff]  ;;  %v1804_v0 = vld [vmem:[%s2869_s0 + $0x3f8] sm:$0xff]  ;;  %v2736_v1 = vld [vmem:[%s2871_s2] ss:$0 sm:$0xff]  ;;  %s2195_s0 = smov [#allocation2]  }
  0x47   :  { %s1599_s2 = sshll.u32 %s2195_s0, 4  ;;  %s1600_s2 = int_to_ptr.vmem [resolvable:$true] %s1599_s2 }
  0x48   :  { %s2173_s20 = scalar_lea.vmem %s1600_s2, 16384  ;;  %p2178_p1 = scmp.lt.s32.totalorder %s1600_s2, %s1600_s2 }
  0x49   :  { %2076 = vmatmul.mubr.msk.f32.gmra.mxu0 %vm55_vm0, %v1711_v7  ;;  %2126 = vmatmul.mubr.msk.f32.gmra.mxu1 %vm55_vm0, %v1776_v8  ;;  %p2174_p0 = scmp.ne.s32.totalorder %s1600_s2, %s2173_s20  ;;  %p2179_p2 = scmp.lt.s32.totalorder %s2173_s20, %s2173_s20 }
  0x4a   :  { %2078 = vmatprep.mubr.msk.f32.mxu0 %vm55_vm0, %v1712_v9  ;;  %2128 = vmatprep.mubr.msk.f32.mxu1 %vm55_vm0, %v1777_v10 }
  0x4b   :  { %p2180_p3 = por %p2179_p2, %p2178_p1 }
  0x4d   :  { %2079 = vmatmul.mubr.msk.f32.gmra.mxu0 %vm55_vm0, %v1713_v11  ;;  %2129 = vmatmul.mubr.msk.f32.gmra.mxu1 %vm55_vm0, %v1778_v12  ;;  %p2181_p4 = pnand %p2180_p3, %p2174_p0 }
  0x4e   :  { %2081 = vmatprep.mubr.msk.f32.mxu0 %vm55_vm0, %v1714_v13  ;;  %2131 = vmatprep.mubr.msk.f32.mxu1 %vm55_vm0, %v1779_v14 }
  0x51   :  { %2082 = vmatmul.mubr.msk.f32.gmra.mxu0 %vm55_vm0, %v1715_v15  ;;  %2132 = vmatmul.mubr.msk.f32.gmra.mxu1 %vm55_vm0, %v1780_v16 }
  0x52   :  { %2084 = vmatprep.mubr.msk.f32.mxu0 %vm55_vm0, %v1716_v17  ;;  %2134 = vmatprep.mubr.msk.f32.mxu1 %vm55_vm0, %v1781_v18 }
  0x55   :  { %2085 = vmatmul.mubr.msk.f32.gmra.mxu0 %vm55_vm0, %v1717_v19  ;;  %2135 = vmatmul.mubr.msk.f32.gmra.mxu1 %vm55_vm0, %v1782_v20 }
  0x56   :  { %2087 = vmatprep.mubr.msk.f32.mxu0 %vm55_vm0, %v1718_v21  ;;  %2137 = vmatprep.mubr.msk.f32.mxu1 %vm55_vm0, %v1783_v22 }
  0x59   :  { %2088 = vmatmul.mubr.msk.f32.gmra.mxu0 %vm55_vm0, %v1719_v23  ;;  %2138 = vmatmul.mubr.msk.f32.gmra.mxu1 %vm55_vm0, %v1784_v24 }
  0x5a   :  { %2090 = vmatprep.mubr.msk.f32.mxu0 %vm55_vm0, %v1720_v25  ;;  %2140 = vmatprep.mubr.msk.f32.mxu1 %vm55_vm0, %v1785_v26 }
  0x5d   :  { %2091 = vmatmul.mubr.msk.f32.gmra.mxu0 %vm55_vm0, %v1721_v27  ;;  %2141 = vmatmul.mubr.msk.f32.gmra.mxu1 %vm55_vm0, %v1786_v28 }
  0x5e   :  { %2093 = vmatprep.mubr.msk.f32.mxu0 %vm55_vm0, %v1722_v29  ;;  %2143 = vmatprep.mubr.msk.f32.mxu1 %vm55_vm0, %v1787_v30 }
  0x61   :  { %2094 = vmatmul.mubr.msk.f32.gmra.mxu0 %vm55_vm0, %v1723_v31  ;;  %2144 = vmatmul.mubr.msk.f32.gmra.mxu1 %vm55_vm0, %v1788_v32 }
  0x62   :  { %2096 = vmatprep.mubr.msk.f32.mxu0 %vm55_vm0, %v1724_v33  ;;  %2146 = vmatprep.mubr.msk.f32.mxu1 %vm55_vm0, %v1789_v34 }
  0x65   :  { %2097 = vmatmul.mubr.msk.f32.gmra.mxu0 %vm55_vm0, %v1725_v35  ;;  %2147 = vmatmul.mubr.msk.f32.gmra.mxu1 %vm55_vm0, %v1790_v36 }
  0x66   :  { %2099 = vmatprep.mubr.msk.f32.mxu0 %vm55_vm0, %v1726_v37  ;;  %2149 = vmatprep.mubr.msk.f32.mxu1 %vm55_vm0, %v1791_v38 }
  0x69   :  { %2100 = vmatmul.mubr.msk.f32.gmra.mxu0 %vm55_vm0, %v1727_v39  ;;  %2150 = vmatmul.mubr.msk.f32.gmra.mxu1 %vm55_vm0, %v1792_v40 }
  0x6a   :  { %2102 = vmatprep.mubr.msk.f32.mxu0 %vm55_vm0, %v1728_v41  ;;  %2152 = vmatprep.mubr.msk.f32.mxu1 %vm55_vm0, %v1793_v42 }
  0x6d   :  { %2103 = vmatmul.mubr.msk.f32.gmra.mxu0 %vm55_vm0, %v1729_v43  ;;  %2153 = vmatmul.mubr.msk.f32.gmra.mxu1 %vm55_vm0, %v1794_v44 }
  0x6e   :  { %2105 = vmatprep.mubr.msk.f32.mxu0 %vm55_vm0, %v1730_v45  ;;  %2155 = vmatprep.mubr.msk.f32.mxu1 %vm55_vm0, %v1795_v46 }
  0x71   :  { %2106 = vmatmul.mubr.msk.f32.gmra.mxu0 %vm55_vm0, %v1731_v47  ;;  %2156 = vmatmul.mubr.msk.f32.gmra.mxu1 %vm55_vm0, %v1796_v48 }
  0x72   :  { %2108 = vmatprep.mubr.msk.f32.mxu0 %vm55_vm0, %v1732_v49  ;;  %2158 = vmatprep.mubr.msk.f32.mxu1 %vm55_vm0, %v1797_v50 }
  0x75   :  { %2109 = vmatmul.mubr.msk.f32.gmra.mxu0 %vm55_vm0, %v1733_v51  ;;  %2159 = vmatmul.mubr.msk.f32.gmra.mxu1 %vm55_vm0, %v1798_v52 }
  0x76   :  { %2111 = vmatprep.mubr.msk.f32.mxu0 %vm55_vm0, %v1734_v53  ;;  %2161 = vmatprep.mubr.msk.f32.mxu1 %vm55_vm0, %v1799_v54 }
  0x79   :  { %2112 = vmatmul.mubr.msk.f32.gmra.mxu0 %vm55_vm0, %v1735_v55  ;;  %2162 = vmatmul.mubr.msk.f32.gmra.mxu1 %vm55_vm0, %v1800_v56 }
  0x7a   :  { %2114 = vmatprep.mubr.msk.f32.mxu0 %vm55_vm0, %v1736_v57  ;;  %2164 = vmatprep.mubr.msk.f32.mxu1 %vm55_vm0, %v1801_v58 }
  0x7d   :  { %2115 = vmatmul.mubr.msk.f32.gmra.mxu0 %vm55_vm0, %v1737_v59  ;;  %2165 = vmatmul.mubr.msk.f32.gmra.mxu1 %vm55_vm0, %v1802_v60 }
  0x7e   :  { %2117 = vmatprep.mubr.msk.f32.mxu0 %vm55_vm0, %v1738_v61  ;;  %2167 = vmatprep.mubr.msk.f32.mxu1 %vm55_vm0, %v1803_v62 }
  0x81   :  { %2118 = vmatmul.mubr.msk.f32.gmra.mxu0 %vm55_vm0, %v1739_v63  ;;  %2168 = vmatmul.mubr.msk.f32.gmra.mxu1 %vm55_vm0, %v1804_v0 }
  0xc5   :  { %v1974_v2 = vpop.f32.mrf.mxu0  ;;  %v2024_v3 = vpop.f32.mrf.mxu1 }
  0xc6   :  { %v224_v4 = vadd.f32 %v1974_v2, %v2736_v1  ;;  %v618_v5 = vadd.f32 %v2024_v3, %v2736_v1 }
  0xc7   :  { %v218_v6 = vpop.f32.mrf.mxu0  ;;  %v612_v7 = vpop.f32.mrf.mxu1 }
  0xc8   :  { %378 = vst [vmem:[#allocation2 + $0x8] sm:$0xff] %v224_v4  ;;  %773 = vst [vmem:[#allocation2 + $0x108] sm:$0xff] %v618_v5  ;;  %v219_v8 = vadd.f32 %v2736_v1, %v218_v6  ;;  %v613_v9 = vadd.f32 %v2736_v1, %v612_v7 }
  0xc9   :  { %v1977_v10 = vpop.f32.mrf.mxu0  ;;  %v2027_v11 = vpop.f32.mrf.mxu1 }
  0xca   :  { %377 = vst [vmem:[#allocation2] sm:$0xff] %v219_v8  ;;  %772 = vst [vmem:[#allocation2 + $0x100] sm:$0xff] %v613_v9  ;;  %v234_v12 = vadd.f32 %v1977_v10, %v2736_v1  ;;  %v628_v13 = vadd.f32 %v2027_v11, %v2736_v1 }
  0xcb   :  { %v228_v14 = vpop.f32.mrf.mxu0  ;;  %v622_v15 = vpop.f32.mrf.mxu1 }
  0xcc   :  { %380 = vst [vmem:[#allocation2 + $0x18] sm:$0xff] %v234_v12  ;;  %775 = vst [vmem:[#allocation2 + $0x118] sm:$0xff] %v628_v13  ;;  %v229_v16 = vadd.f32 %v2736_v1, %v228_v14  ;;  %v623_v17 = vadd.f32 %v2736_v1, %v622_v15 }
  0xcd   :  { %v1980_v18 = vpop.f32.mrf.mxu0  ;;  %v2030_v19 = vpop.f32.mrf.mxu1 }
  0xce   :  { %379 = vst [vmem:[#allocation2 + $0x10] sm:$0xff] %v229_v16  ;;  %774 = vst [vmem:[#allocation2 + $0x110] sm:$0xff] %v623_v17  ;;  %v244_v20 = vadd.f32 %v1980_v18, %v2736_v1  ;;  %v638_v21 = vadd.f32 %v2030_v19, %v2736_v1 }
  0xcf   :  { %v238_v22 = vpop.f32.mrf.mxu0  ;;  %v632_v23 = vpop.f32.mrf.mxu1 }
  0xd0   :  { %382 = vst [vmem:[#allocation2 + $0x28] sm:$0xff] %v244_v20  ;;  %777 = vst [vmem:[#allocation2 + $0x128] sm:$0xff] %v638_v21  ;;  %v239_v24 = vadd.f32 %v2736_v1, %v238_v22  ;;  %v633_v25 = vadd.f32 %v2736_v1, %v632_v23 }
  0xd1   :  { %v1983_v26 = vpop.f32.mrf.mxu0  ;;  %v2033_v27 = vpop.f32.mrf.mxu1 }
  0xd2   :  { %381 = vst [vmem:[#allocation2 + $0x20] sm:$0xff] %v239_v24  ;;  %776 = vst [vmem:[#allocation2 + $0x120] sm:$0xff] %v633_v25  ;;  %v254_v28 = vadd.f32 %v1983_v26, %v2736_v1  ;;  %v648_v29 = vadd.f32 %v2033_v27, %v2736_v1 }
  0xd3   :  { %v248_v30 = vpop.f32.mrf.mxu0  ;;  %v642_v31 = vpop.f32.mrf.mxu1 }
  0xd4   :  { %384 = vst [vmem:[#allocation2 + $0x38] sm:$0xff] %v254_v28  ;;  %779 = vst [vmem:[#allocation2 + $0x138] sm:$0xff] %v648_v29  ;;  %v249_v32 = vadd.f32 %v2736_v1, %v248_v30  ;;  %v643_v33 = vadd.f32 %v2736_v1, %v642_v31 }
  0xd5   :  { %v1986_v34 = vpop.f32.mrf.mxu0  ;;  %v2036_v35 = vpop.f32.mrf.mxu1 }
  0xd6   :  { %383 = vst [vmem:[#allocation2 + $0x30] sm:$0xff] %v249_v32  ;;  %778 = vst [vmem:[#allocation2 + $0x130] sm:$0xff] %v643_v33  ;;  %v264_v36 = vadd.f32 %v1986_v34, %v2736_v1  ;;  %v658_v37 = vadd.f32 %v2036_v35, %v2736_v1 }
  0xd7   :  { %v258_v38 = vpop.f32.mrf.mxu0  ;;  %v652_v39 = vpop.f32.mrf.mxu1 }
  0xd8   :  { %386 = vst [vmem:[#allocation2 + $0x48] sm:$0xff] %v264_v36  ;;  %781 = vst [vmem:[#allocation2 + $0x148] sm:$0xff] %v658_v37  ;;  %v259_v40 = vadd.f32 %v2736_v1, %v258_v38  ;;  %v653_v41 = vadd.f32 %v2736_v1, %v652_v39 }
  0xd9   :  { %v1989_v42 = vpop.f32.mrf.mxu0  ;;  %v2039_v43 = vpop.f32.mrf.mxu1 }
  0xda   :  { %385 = vst [vmem:[#allocation2 + $0x40] sm:$0xff] %v259_v40  ;;  %780 = vst [vmem:[#allocation2 + $0x140] sm:$0xff] %v653_v41  ;;  %v274_v44 = vadd.f32 %v1989_v42, %v2736_v1  ;;  %v668_v45 = vadd.f32 %v2039_v43, %v2736_v1 }
  0xdb   :  { %v268_v46 = vpop.f32.mrf.mxu0  ;;  %v662_v47 = vpop.f32.mrf.mxu1 }
  0xdc   :  { %388 = vst [vmem:[#allocation2 + $0x58] sm:$0xff] %v274_v44  ;;  %783 = vst [vmem:[#allocation2 + $0x158] sm:$0xff] %v668_v45  ;;  %v269_v48 = vadd.f32 %v2736_v1, %v268_v46  ;;  %v663_v49 = vadd.f32 %v2736_v1, %v662_v47 }
  0xdd   :  { %v1992_v50 = vpop.f32.mrf.mxu0  ;;  %v2042_v51 = vpop.f32.mrf.mxu1 }
  0xde   :  { %387 = vst [vmem:[#allocation2 + $0x50] sm:$0xff] %v269_v48  ;;  %782 = vst [vmem:[#allocation2 + $0x150] sm:$0xff] %v663_v49  ;;  %v284_v52 = vadd.f32 %v1992_v50, %v2736_v1  ;;  %v678_v53 = vadd.f32 %v2042_v51, %v2736_v1 }
  0xdf   :  { %v278_v54 = vpop.f32.mrf.mxu0  ;;  %v672_v55 = vpop.f32.mrf.mxu1 }
  0xe0   :  { %390 = vst [vmem:[#allocation2 + $0x68] sm:$0xff] %v284_v52  ;;  %785 = vst [vmem:[#allocation2 + $0x168] sm:$0xff] %v678_v53  ;;  %v279_v56 = vadd.f32 %v2736_v1, %v278_v54  ;;  %v673_v57 = vadd.f32 %v2736_v1, %v672_v55 }
  0xe1   :  { %v1995_v58 = vpop.f32.mrf.mxu0  ;;  %v2045_v59 = vpop.f32.mrf.mxu1 }
  0xe2   :  { %389 = vst [vmem:[#allocation2 + $0x60] sm:$0xff] %v279_v56  ;;  %784 = vst [vmem:[#allocation2 + $0x160] sm:$0xff] %v673_v57  ;;  %v294_v60 = vadd.f32 %v1995_v58, %v2736_v1  ;;  %v688_v61 = vadd.f32 %v2045_v59, %v2736_v1 }
  0xe3   :  { %v288_v62 = vpop.f32.mrf.mxu0  ;;  %v682_v63 = vpop.f32.mrf.mxu1 }
  0xe4   :  { %392 = vst [vmem:[#allocation2 + $0x78] sm:$0xff] %v294_v60  ;;  %787 = vst [vmem:[#allocation2 + $0x178] sm:$0xff] %v688_v61  ;;  %v289_v0 = vadd.f32 %v2736_v1, %v288_v62  ;;  %v683_v2 = vadd.f32 %v2736_v1, %v682_v63 }
  0xe5   :  { %v1998_v3 = vpop.f32.mrf.mxu0  ;;  %v2048_v4 = vpop.f32.mrf.mxu1 }
  0xe6   :  { %391 = vst [vmem:[#allocation2 + $0x70] sm:$0xff] %v289_v0  ;;  %786 = vst [vmem:[#allocation2 + $0x170] sm:$0xff] %v683_v2  ;;  %v304_v5 = vadd.f32 %v1998_v3, %v2736_v1  ;;  %v698_v6 = vadd.f32 %v2048_v4, %v2736_v1 }
  0xe7   :  { %v298_v7 = vpop.f32.mrf.mxu0  ;;  %v692_v8 = vpop.f32.mrf.mxu1 }
  0xe8   :  { %394 = vst [vmem:[#allocation2 + $0x88] sm:$0xff] %v304_v5  ;;  %789 = vst [vmem:[#allocation2 + $0x188] sm:$0xff] %v698_v6  ;;  %v299_v9 = vadd.f32 %v2736_v1, %v298_v7  ;;  %v693_v10 = vadd.f32 %v2736_v1, %v692_v8 }
  0xe9   :  { %v2001_v11 = vpop.f32.mrf.mxu0  ;;  %v2051_v12 = vpop.f32.mrf.mxu1 }
  0xea   :  { %393 = vst [vmem:[#allocation2 + $0x80] sm:$0xff] %v299_v9  ;;  %788 = vst [vmem:[#allocation2 + $0x180] sm:$0xff] %v693_v10  ;;  %v314_v13 = vadd.f32 %v2001_v11, %v2736_v1  ;;  %v708_v14 = vadd.f32 %v2051_v12, %v2736_v1 }
  0xeb   :  { %v308_v15 = vpop.f32.mrf.mxu0  ;;  %v702_v16 = vpop.f32.mrf.mxu1 }
  0xec   :  { %396 = vst [vmem:[#allocation2 + $0x98] sm:$0xff] %v314_v13  ;;  %791 = vst [vmem:[#allocation2 + $0x198] sm:$0xff] %v708_v14  ;;  %v309_v17 = vadd.f32 %v2736_v1, %v308_v15  ;;  %v703_v18 = vadd.f32 %v2736_v1, %v702_v16 }
  0xed   :  { %v2004_v19 = vpop.f32.mrf.mxu0  ;;  %v2054_v20 = vpop.f32.mrf.mxu1 }
  0xee   :  { %395 = vst [vmem:[#allocation2 + $0x90] sm:$0xff] %v309_v17  ;;  %790 = vst [vmem:[#allocation2 + $0x190] sm:$0xff] %v703_v18  ;;  %v324_v21 = vadd.f32 %v2004_v19, %v2736_v1  ;;  %v718_v22 = vadd.f32 %v2054_v20, %v2736_v1 }
  0xef   :  { %v318_v23 = vpop.f32.mrf.mxu0  ;;  %v712_v24 = vpop.f32.mrf.mxu1 }
  0xf0   :  { %398 = vst [vmem:[#allocation2 + $0xa8] sm:$0xff] %v324_v21  ;;  %793 = vst [vmem:[#allocation2 + $0x1a8] sm:$0xff] %v718_v22  ;;  %v319_v25 = vadd.f32 %v2736_v1, %v318_v23  ;;  %v713_v26 = vadd.f32 %v2736_v1, %v712_v24 }
  0xf1   :  { %v2007_v27 = vpop.f32.mrf.mxu0  ;;  %v2057_v28 = vpop.f32.mrf.mxu1 }
  0xf2   :  { %397 = vst [vmem:[#allocation2 + $0xa0] sm:$0xff] %v319_v25  ;;  %792 = vst [vmem:[#allocation2 + $0x1a0] sm:$0xff] %v713_v26  ;;  %v334_v29 = vadd.f32 %v2007_v27, %v2736_v1  ;;  %v728_v30 = vadd.f32 %v2057_v28, %v2736_v1 }
  0xf3   :  { %v328_v31 = vpop.f32.mrf.mxu0  ;;  %v722_v32 = vpop.f32.mrf.mxu1 }
  0xf4   :  { %400 = vst [vmem:[#allocation2 + $0xb8] sm:$0xff] %v334_v29  ;;  %795 = vst [vmem:[#allocation2 + $0x1b8] sm:$0xff] %v728_v30  ;;  %v329_v33 = vadd.f32 %v2736_v1, %v328_v31  ;;  %v723_v34 = vadd.f32 %v2736_v1, %v722_v32 }
  0xf5   :  { %v2010_v35 = vpop.f32.mrf.mxu0  ;;  %v2060_v36 = vpop.f32.mrf.mxu1 }
  0xf6   :  { %399 = vst [vmem:[#allocation2 + $0xb0] sm:$0xff] %v329_v33  ;;  %794 = vst [vmem:[#allocation2 + $0x1b0] sm:$0xff] %v723_v34  ;;  %v344_v37 = vadd.f32 %v2010_v35, %v2736_v1  ;;  %v738_v38 = vadd.f32 %v2060_v36, %v2736_v1 }
  0xf7   :  { %v338_v39 = vpop.f32.mrf.mxu0  ;;  %v732_v40 = vpop.f32.mrf.mxu1 }
  0xf8   :  { %402 = vst [vmem:[#allocation2 + $0xc8] sm:$0xff] %v344_v37  ;;  %797 = vst [vmem:[#allocation2 + $0x1c8] sm:$0xff] %v738_v38  ;;  %v339_v41 = vadd.f32 %v2736_v1, %v338_v39  ;;  %v733_v42 = vadd.f32 %v2736_v1, %v732_v40 }
  0xf9   :  { %v2013_v43 = vpop.f32.mrf.mxu0  ;;  %v2063_v44 = vpop.f32.mrf.mxu1 }
  0xfa   :  { %401 = vst [vmem:[#allocation2 + $0xc0] sm:$0xff] %v339_v41  ;;  %796 = vst [vmem:[#allocation2 + $0x1c0] sm:$0xff] %v733_v42  ;;  %v354_v45 = vadd.f32 %v2013_v43, %v2736_v1  ;;  %v748_v46 = vadd.f32 %v2063_v44, %v2736_v1 }
  0xfb   :  { %v348_v47 = vpop.f32.mrf.mxu0  ;;  %v742_v48 = vpop.f32.mrf.mxu1 }
  0xfc   :  { %404 = vst [vmem:[#allocation2 + $0xd8] sm:$0xff] %v354_v45  ;;  %799 = vst [vmem:[#allocation2 + $0x1d8] sm:$0xff] %v748_v46  ;;  %v349_v49 = vadd.f32 %v2736_v1, %v348_v47  ;;  %v743_v50 = vadd.f32 %v2736_v1, %v742_v48 }
  0xfd   :  { %v2016_v51 = vpop.f32.mrf.mxu0  ;;  %v2066_v52 = vpop.f32.mrf.mxu1 }
  0xfe   :  { %403 = vst [vmem:[#allocation2 + $0xd0] sm:$0xff] %v349_v49  ;;  %798 = vst [vmem:[#allocation2 + $0x1d0] sm:$0xff] %v743_v50  ;;  %v364_v53 = vadd.f32 %v2016_v51, %v2736_v1  ;;  %v758_v54 = vadd.f32 %v2066_v52, %v2736_v1 }
  0xff   :  { %v358_v55 = vpop.f32.mrf.mxu0  ;;  %v752_v56 = vpop.f32.mrf.mxu1 }
 0x100   :  { %406 = vst [vmem:[#allocation2 + $0xe8] sm:$0xff] %v364_v53  ;;  %801 = vst [vmem:[#allocation2 + $0x1e8] sm:$0xff] %v758_v54  ;;  %v359_v57 = vadd.f32 %v2736_v1, %v358_v55  ;;  %v753_v58 = vadd.f32 %v2736_v1, %v752_v56 }
 0x101   :  { %v2019_v59 = vpop.f32.mrf.mxu0  ;;  %v2069_v60 = vpop.f32.mrf.mxu1 }
 0x102   :  { %405 = vst [vmem:[#allocation2 + $0xe0] sm:$0xff] %v359_v57  ;;  %800 = vst [vmem:[#allocation2 + $0x1e0] sm:$0xff] %v753_v58  ;;  %v374_v61 = vadd.f32 %v2019_v59, %v2736_v1  ;;  %v768_v62 = vadd.f32 %v2069_v60, %v2736_v1 }
 0x103   :  { %v368_v63 = vpop.f32.mrf.mxu0  ;;  %v762_v0 = vpop.f32.mrf.mxu1 }
 0x104   :  { %408 = vst [vmem:[#allocation2 + $0xf8] sm:$0xff] %v374_v61  ;;  %803 = vst [vmem:[#allocation2 + $0x1f8] sm:$0xff] %v768_v62  ;;  %v369_v2 = vadd.f32 %v2736_v1, %v368_v63  ;;  %v763_v3 = vadd.f32 %v2736_v1, %v762_v0 }
 0x105   :  { %v2074_v4 = vpop.f32.mrf.mxu0  ;;  %v2124_v5 = vpop.f32.mrf.mxu1 }
 0x106   :  { %407 = vst [vmem:[#allocation2 + $0xf0] sm:$0xff] %v369_v2  ;;  %802 = vst [vmem:[#allocation2 + $0x1f0] sm:$0xff] %v763_v3  ;;  %v1013_v6 = vadd.f32 %v2074_v4, %v2736_v1  ;;  %v1408_v7 = vadd.f32 %v2124_v5, %v2736_v1 }
 0x107   :  { %v1007_v8 = vpop.f32.mrf.mxu0  ;;  %v1402_v9 = vpop.f32.mrf.mxu1 }
 0x108   :  { %1168 = vst [vmem:[#allocation2 + $0x208] sm:$0xff] %v1013_v6  ;;  %1563 = vst [vmem:[#allocation2 + $0x308] sm:$0xff] %v1408_v7  ;;  %v1008_v10 = vadd.f32 %v2736_v1, %v1007_v8  ;;  %v1403_v11 = vadd.f32 %v2736_v1, %v1402_v9 }
 0x109   :  { %v2077_v12 = vpop.f32.mrf.mxu0  ;;  %v2127_v13 = vpop.f32.mrf.mxu1 }
 0x10a   :  { %1167 = vst [vmem:[#allocation2 + $0x200] sm:$0xff] %v1008_v10  ;;  %1562 = vst [vmem:[#allocation2 + $0x300] sm:$0xff] %v1403_v11  ;;  %v1023_v14 = vadd.f32 %v2077_v12, %v2736_v1  ;;  %v1418_v15 = vadd.f32 %v2127_v13, %v2736_v1 }
 0x10b   :  { %v1017_v16 = vpop.f32.mrf.mxu0  ;;  %v1412_v17 = vpop.f32.mrf.mxu1 }
 0x10c   :  { %1170 = vst [vmem:[#allocation2 + $0x218] sm:$0xff] %v1023_v14  ;;  %1565 = vst [vmem:[#allocation2 + $0x318] sm:$0xff] %v1418_v15  ;;  %v1018_v18 = vadd.f32 %v2736_v1, %v1017_v16  ;;  %v1413_v19 = vadd.f32 %v2736_v1, %v1412_v17 }
 0x10d   :  { %v2080_v20 = vpop.f32.mrf.mxu0  ;;  %v2130_v21 = vpop.f32.mrf.mxu1 }
 0x10e   :  { %1169 = vst [vmem:[#allocation2 + $0x210] sm:$0xff] %v1018_v18  ;;  %1564 = vst [vmem:[#allocation2 + $0x310] sm:$0xff] %v1413_v19  ;;  %v1033_v22 = vadd.f32 %v2080_v20, %v2736_v1  ;;  %v1428_v23 = vadd.f32 %v2130_v21, %v2736_v1 }
 0x10f   :  { %v1027_v24 = vpop.f32.mrf.mxu0  ;;  %v1422_v25 = vpop.f32.mrf.mxu1 }
 0x110   :  { %1172 = vst [vmem:[#allocation2 + $0x228] sm:$0xff] %v1033_v22  ;;  %1567 = vst [vmem:[#allocation2 + $0x328] sm:$0xff] %v1428_v23  ;;  %v1028_v26 = vadd.f32 %v2736_v1, %v1027_v24  ;;  %v1423_v27 = vadd.f32 %v2736_v1, %v1422_v25 }
 0x111   :  { %v2083_v28 = vpop.f32.mrf.mxu0  ;;  %v2133_v29 = vpop.f32.mrf.mxu1 }
 0x112   :  { %1171 = vst [vmem:[#allocation2 + $0x220] sm:$0xff] %v1028_v26  ;;  %1566 = vst [vmem:[#allocation2 + $0x320] sm:$0xff] %v1423_v27  ;;  %v1043_v30 = vadd.f32 %v2083_v28, %v2736_v1  ;;  %v1438_v31 = vadd.f32 %v2133_v29, %v2736_v1 }
 0x113   :  { %v1037_v32 = vpop.f32.mrf.mxu0  ;;  %v1432_v33 = vpop.f32.mrf.mxu1 }
 0x114   :  { %1174 = vst [vmem:[#allocation2 + $0x238] sm:$0xff] %v1043_v30  ;;  %1569 = vst [vmem:[#allocation2 + $0x338] sm:$0xff] %v1438_v31  ;;  %v1038_v34 = vadd.f32 %v2736_v1, %v1037_v32  ;;  %v1433_v35 = vadd.f32 %v2736_v1, %v1432_v33 }
 0x115   :  { %v2086_v36 = vpop.f32.mrf.mxu0  ;;  %v2136_v37 = vpop.f32.mrf.mxu1 }
 0x116   :  { %1173 = vst [vmem:[#allocation2 + $0x230] sm:$0xff] %v1038_v34  ;;  %1568 = vst [vmem:[#allocation2 + $0x330] sm:$0xff] %v1433_v35  ;;  %v1053_v38 = vadd.f32 %v2086_v36, %v2736_v1  ;;  %v1448_v39 = vadd.f32 %v2136_v37, %v2736_v1 }
 0x117   :  { %v1047_v40 = vpop.f32.mrf.mxu0  ;;  %v1442_v41 = vpop.f32.mrf.mxu1 }
 0x118   :  { %1176 = vst [vmem:[#allocation2 + $0x248] sm:$0xff] %v1053_v38  ;;  %1571 = vst [vmem:[#allocation2 + $0x348] sm:$0xff] %v1448_v39  ;;  %v1048_v42 = vadd.f32 %v2736_v1, %v1047_v40  ;;  %v1443_v43 = vadd.f32 %v2736_v1, %v1442_v41 }
 0x119   :  { %v2089_v44 = vpop.f32.mrf.mxu0  ;;  %v2139_v45 = vpop.f32.mrf.mxu1 }
 0x11a   :  { %1175 = vst [vmem:[#allocation2 + $0x240] sm:$0xff] %v1048_v42  ;;  %1570 = vst [vmem:[#allocation2 + $0x340] sm:$0xff] %v1443_v43  ;;  %v1063_v46 = vadd.f32 %v2089_v44, %v2736_v1  ;;  %v1458_v47 = vadd.f32 %v2139_v45, %v2736_v1 }
 0x11b   :  { %v1057_v48 = vpop.f32.mrf.mxu0  ;;  %v1452_v49 = vpop.f32.mrf.mxu1 }
 0x11c   :  { %1178 = vst [vmem:[#allocation2 + $0x258] sm:$0xff] %v1063_v46  ;;  %1573 = vst [vmem:[#allocation2 + $0x358] sm:$0xff] %v1458_v47  ;;  %v1058_v50 = vadd.f32 %v2736_v1, %v1057_v48  ;;  %v1453_v51 = vadd.f32 %v2736_v1, %v1452_v49 }
 0x11d   :  { %v2092_v52 = vpop.f32.mrf.mxu0  ;;  %v2142_v53 = vpop.f32.mrf.mxu1 }
 0x11e   :  { %1177 = vst [vmem:[#allocation2 + $0x250] sm:$0xff] %v1058_v50  ;;  %1572 = vst [vmem:[#allocation2 + $0x350] sm:$0xff] %v1453_v51  ;;  %v1073_v54 = vadd.f32 %v2092_v52, %v2736_v1  ;;  %v1468_v55 = vadd.f32 %v2142_v53, %v2736_v1 }
 0x11f   :  { %v1067_v56 = vpop.f32.mrf.mxu0  ;;  %v1462_v57 = vpop.f32.mrf.mxu1 }
 0x120   :  { %1180 = vst [vmem:[#allocation2 + $0x268] sm:$0xff] %v1073_v54  ;;  %1575 = vst [vmem:[#allocation2 + $0x368] sm:$0xff] %v1468_v55  ;;  %v1068_v58 = vadd.f32 %v2736_v1, %v1067_v56  ;;  %v1463_v59 = vadd.f32 %v2736_v1, %v1462_v57 }
 0x121   :  { %v2095_v60 = vpop.f32.mrf.mxu0  ;;  %v2145_v61 = vpop.f32.mrf.mxu1 }
 0x122   :  { %1179 = vst [vmem:[#allocation2 + $0x260] sm:$0xff] %v1068_v58  ;;  %1574 = vst [vmem:[#allocation2 + $0x360] sm:$0xff] %v1463_v59  ;;  %v1083_v62 = vadd.f32 %v2095_v60, %v2736_v1  ;;  %v1478_v63 = vadd.f32 %v2145_v61, %v2736_v1 }
 0x123   :  { %v1077_v0 = vpop.f32.mrf.mxu0  ;;  %v1472_v2 = vpop.f32.mrf.mxu1 }
 0x124   :  { %1182 = vst [vmem:[#allocation2 + $0x278] sm:$0xff] %v1083_v62  ;;  %1577 = vst [vmem:[#allocation2 + $0x378] sm:$0xff] %v1478_v63  ;;  %v1078_v3 = vadd.f32 %v2736_v1, %v1077_v0  ;;  %v1473_v4 = vadd.f32 %v2736_v1, %v1472_v2 }
 0x125   :  { %v2098_v5 = vpop.f32.mrf.mxu0  ;;  %v2148_v6 = vpop.f32.mrf.mxu1 }
 0x126   :  { %1181 = vst [vmem:[#allocation2 + $0x270] sm:$0xff] %v1078_v3  ;;  %1576 = vst [vmem:[#allocation2 + $0x370] sm:$0xff] %v1473_v4  ;;  %v1093_v7 = vadd.f32 %v2098_v5, %v2736_v1  ;;  %v1488_v8 = vadd.f32 %v2148_v6, %v2736_v1 }
 0x127   :  { %v1087_v9 = vpop.f32.mrf.mxu0  ;;  %v1482_v10 = vpop.f32.mrf.mxu1 }
 0x128   :  { %1184 = vst [vmem:[#allocation2 + $0x288] sm:$0xff] %v1093_v7  ;;  %1579 = vst [vmem:[#allocation2 + $0x388] sm:$0xff] %v1488_v8  ;;  %v1088_v11 = vadd.f32 %v2736_v1, %v1087_v9  ;;  %v1483_v12 = vadd.f32 %v2736_v1, %v1482_v10 }
 0x129   :  { %v2101_v13 = vpop.f32.mrf.mxu0  ;;  %v2151_v14 = vpop.f32.mrf.mxu1 }
 0x12a   :  { %1183 = vst [vmem:[#allocation2 + $0x280] sm:$0xff] %v1088_v11  ;;  %1578 = vst [vmem:[#allocation2 + $0x380] sm:$0xff] %v1483_v12  ;;  %v1103_v15 = vadd.f32 %v2101_v13, %v2736_v1  ;;  %v1498_v16 = vadd.f32 %v2151_v14, %v2736_v1 }
 0x12b   :  { %v1097_v17 = vpop.f32.mrf.mxu0  ;;  %v1492_v18 = vpop.f32.mrf.mxu1 }
 0x12c   :  { %1186 = vst [vmem:[#allocation2 + $0x298] sm:$0xff] %v1103_v15  ;;  %1581 = vst [vmem:[#allocation2 + $0x398] sm:$0xff] %v1498_v16  ;;  %v1098_v19 = vadd.f32 %v2736_v1, %v1097_v17  ;;  %v1493_v20 = vadd.f32 %v2736_v1, %v1492_v18 }
 0x12d   :  { %v2104_v21 = vpop.f32.mrf.mxu0  ;;  %v2154_v22 = vpop.f32.mrf.mxu1 }
 0x12e   :  { %1185 = vst [vmem:[#allocation2 + $0x290] sm:$0xff] %v1098_v19  ;;  %1580 = vst [vmem:[#allocation2 + $0x390] sm:$0xff] %v1493_v20  ;;  %v1113_v23 = vadd.f32 %v2104_v21, %v2736_v1  ;;  %v1508_v24 = vadd.f32 %v2154_v22, %v2736_v1 }
 0x12f   :  { %v1107_v25 = vpop.f32.mrf.mxu0  ;;  %v1502_v26 = vpop.f32.mrf.mxu1 }
 0x130   :  { %1188 = vst [vmem:[#allocation2 + $0x2a8] sm:$0xff] %v1113_v23  ;;  %1583 = vst [vmem:[#allocation2 + $0x3a8] sm:$0xff] %v1508_v24  ;;  %v1108_v27 = vadd.f32 %v2736_v1, %v1107_v25  ;;  %v1503_v28 = vadd.f32 %v2736_v1, %v1502_v26 }
 0x131   :  { %v2107_v29 = vpop.f32.mrf.mxu0  ;;  %v2157_v30 = vpop.f32.mrf.mxu1 }
 0x132   :  { %1187 = vst [vmem:[#allocation2 + $0x2a0] sm:$0xff] %v1108_v27  ;;  %1582 = vst [vmem:[#allocation2 + $0x3a0] sm:$0xff] %v1503_v28  ;;  %v1123_v31 = vadd.f32 %v2107_v29, %v2736_v1  ;;  %v1518_v32 = vadd.f32 %v2157_v30, %v2736_v1 }
 0x133   :  { %v1117_v33 = vpop.f32.mrf.mxu0  ;;  %v1512_v34 = vpop.f32.mrf.mxu1 }
 0x134   :  { %1190 = vst [vmem:[#allocation2 + $0x2b8] sm:$0xff] %v1123_v31  ;;  %1585 = vst [vmem:[#allocation2 + $0x3b8] sm:$0xff] %v1518_v32  ;;  %v1118_v35 = vadd.f32 %v2736_v1, %v1117_v33  ;;  %v1513_v36 = vadd.f32 %v2736_v1, %v1512_v34 }
 0x135   :  { %v2110_v37 = vpop.f32.mrf.mxu0  ;;  %v2160_v38 = vpop.f32.mrf.mxu1 }
 0x136   :  { %1189 = vst [vmem:[#allocation2 + $0x2b0] sm:$0xff] %v1118_v35  ;;  %1584 = vst [vmem:[#allocation2 + $0x3b0] sm:$0xff] %v1513_v36  ;;  %v1133_v39 = vadd.f32 %v2110_v37, %v2736_v1  ;;  %v1528_v40 = vadd.f32 %v2160_v38, %v2736_v1 }
 0x137   :  { %v1127_v41 = vpop.f32.mrf.mxu0  ;;  %v1522_v42 = vpop.f32.mrf.mxu1 }
 0x138   :  { %1192 = vst [vmem:[#allocation2 + $0x2c8] sm:$0xff] %v1133_v39  ;;  %1587 = vst [vmem:[#allocation2 + $0x3c8] sm:$0xff] %v1528_v40  ;;  %v1128_v43 = vadd.f32 %v2736_v1, %v1127_v41  ;;  %v1523_v44 = vadd.f32 %v2736_v1, %v1522_v42 }
 0x139   :  { %v2113_v45 = vpop.f32.mrf.mxu0  ;;  %v2163_v46 = vpop.f32.mrf.mxu1 }
 0x13a   :  { %1191 = vst [vmem:[#allocation2 + $0x2c0] sm:$0xff] %v1128_v43  ;;  %1586 = vst [vmem:[#allocation2 + $0x3c0] sm:$0xff] %v1523_v44  ;;  %v1143_v47 = vadd.f32 %v2113_v45, %v2736_v1  ;;  %v1538_v48 = vadd.f32 %v2163_v46, %v2736_v1 }
 0x13b   :  { %v1137_v49 = vpop.f32.mrf.mxu0  ;;  %v1532_v50 = vpop.f32.mrf.mxu1 }
 0x13c   :  { %1194 = vst [vmem:[#allocation2 + $0x2d8] sm:$0xff] %v1143_v47  ;;  %1589 = vst [vmem:[#allocation2 + $0x3d8] sm:$0xff] %v1538_v48  ;;  %v1138_v51 = vadd.f32 %v2736_v1, %v1137_v49  ;;  %v1533_v52 = vadd.f32 %v2736_v1, %v1532_v50 }
 0x13d   :  { %v2116_v53 = vpop.f32.mrf.mxu0  ;;  %v2166_v54 = vpop.f32.mrf.mxu1 }
 0x13e   :  { %1193 = vst [vmem:[#allocation2 + $0x2d0] sm:$0xff] %v1138_v51  ;;  %1588 = vst [vmem:[#allocation2 + $0x3d0] sm:$0xff] %v1533_v52  ;;  %v1153_v55 = vadd.f32 %v2116_v53, %v2736_v1  ;;  %v1548_v56 = vadd.f32 %v2166_v54, %v2736_v1 }
 0x13f   :  { %v1147_v57 = vpop.f32.mrf.mxu0  ;;  %v1542_v58 = vpop.f32.mrf.mxu1 }
 0x140   :  { %1196 = vst [vmem:[#allocation2 + $0x2e8] sm:$0xff] %v1153_v55  ;;  %1591 = vst [vmem:[#allocation2 + $0x3e8] sm:$0xff] %v1548_v56  ;;  %v1148_v59 = vadd.f32 %v2736_v1, %v1147_v57  ;;  %v1543_v60 = vadd.f32 %v2736_v1, %v1542_v58 }
 0x141   :  { %v2119_v61 = vpop.f32.mrf.mxu0  ;;  %v2169_v62 = vpop.f32.mrf.mxu1 }
 0x142   :  { %1195 = vst [vmem:[#allocation2 + $0x2e0] sm:$0xff] %v1148_v59  ;;  %1590 = vst [vmem:[#allocation2 + $0x3e0] sm:$0xff] %v1543_v60  ;;  %v1163_v63 = vadd.f32 %v2119_v61, %v2736_v1  ;;  %v1558_v0 = vadd.f32 %v2169_v62, %v2736_v1 }
 0x143   :  { %v1157_v2 = vpop.f32.mrf.mxu0  ;;  %v1552_v3 = vpop.f32.mrf.mxu1 }
 0x144   :  { %1198 = vst [vmem:[#allocation2 + $0x2f8] sm:$0xff] %v1163_v63  ;;  %1593 = vst [vmem:[#allocation2 + $0x3f8] sm:$0xff] %v1558_v0  ;;  %v1158_v4 = vadd.f32 %v2736_v1, %v1157_v2  ;;  %v1553_v5 = vadd.f32 %v2736_v1, %v1552_v3 }
 0x146   :  { %1197 = vst [vmem:[#allocation2 + $0x2f0] sm:$0xff] %v1158_v4  ;;  %1592 = vst [vmem:[#allocation2 + $0x3f0] sm:$0xff] %v1553_v5 }
 0x147   :  { %2184 = shalt.err (!%p2181_p4)
}
 0x148   :  { %s2196_s21 = smov 128   ;;  %s2197_s1 = smov 8  }
 0x149   :  { %1605 = dma.vmem_to_hbm [thread:$0]  %s1600_s2, 16384, %s2872_s3, [#allocation3], %s2196_s21, %s2196_s21, %s2197_s1  }
 0x14a   :  { %2193 = dma.done.wait [#allocation3], 16384  }
 0x14b   :  { %2194 = vsyncadd [#allocation3], 4294950912 }
 0x14c   :  { %1609 = vsyncpa [#allocation3], 1 }

</bundles_post_ra>
